<compile_context>
chip_gen: v5e
topology: v5e:2x2
jax: 0.10.0
libtpu: 0.0.40
codegen_flags: <defaults>
</compile_context>

<pallas_src>
import math

import jax
import jax.numpy as jnp
from jax.experimental import pallas as pl
from jax.experimental.pallas import tpu as pltpu

INPUT_DIM = 64          # module default
NUM_QUBITS = 8          # module default
NUM_ARCHETYPES = 5
# |amplitude| of QFT applied to |0...0>: uniform superposition, 1/sqrt(2^n)
QUANTUM_ABS = 1.0 / math.sqrt(2 ** NUM_QUBITS)

SUBLANE = 8             # sublane alignment for the batch (row) dim
MAX_BLOCK_B = 2048      # per-grid-step batch tile (mem-bound roofline sweet spot)


def _round_up(n: int, m: int) -> int:
    return ((n + m - 1) // m) * m


def _fused_archetype_kernel(x_ref, w_ref, o_ref):
    """x_ref: (bb, D) activations, w_ref: (D, D) fused weight, o_ref: (bb, D).

    Single MXU matmul; the 5-archetype mean and the QFT amplitude are already
    folded into w_ref.  Any f32 -> compute-dtype cast of x rides the VPU for
    free underneath the DMA pipeline.
    """
    w = w_ref[...]
    x = x_ref[...].astype(w.dtype)
    o_ref[...] = jnp.dot(
        x, w, preferred_element_type=jnp.float32
    ).astype(o_ref.dtype)


def quantum_archetype_forward(w_fused: jax.Array, x: jax.Array) -> jax.Array:
    """Forward pass.

    w_fused: (D, D) fused, pre-transposed archetype weight from
             init_archetype_weights (f32 or bf16).
    x:       (D,) single vector (module semantics) or (B, D) batch
             (f32 or bf16).
    Returns float32 with the same leading shape as x.
    """
    d = w_fused.shape[0]
    assert w_fused.shape == (d, d)

    # Single-vector (module forward signature) / tiny-batch fast path:
    # pallas_call launch overhead dominates a <=8x64 @ 64x64 matmul, so let
    # plain XLA do it (and fuse it with surrounding ops).
    if x.ndim == 1 or x.shape[0] < SUBLANE:
        y = jnp.dot(
            x.astype(w_fused.dtype),
            w_fused,
            precision=jax.lax.Precision.HIGHEST,
            preferred_element_type=jnp.float32,
        )
        return y.astype(jnp.float32)

    b, dx = x.shape
    assert dx == d

    # Batch tile: large (8-row aligned, up to MAX_BLOCK_B), chosen with cdiv +
    # partial-block masking (no batch padding, no shrinking-block search), and
    # capped so the grid has >= 2 parallel steps when B >= 16 so v7x's two
    # TensorCores both get work (no-op on v5e/v6e).
    block_b = min(MAX_BLOCK_B, _round_up(b, SUBLANE))
    if b >= 2 * SUBLANE:
        block_b = min(block_b, _round_up(pl.cdiv(b, 2), SUBLANE))
    grid = (pl.cdiv(b, block_b),)

    return pl.pallas_call(
        _fused_archetype_kernel,
        out_shape=jax.ShapeDtypeStruct((b, d), jnp.float32),
        grid=grid,
        in_specs=[
            # Activations unpadded: last dim 64 == full array dim satisfies
            # the (8,128) rule; no zero lanes in HBM traffic.
            pl.BlockSpec((block_b, d), lambda i: (i, 0)),
            # Fused weight: full (64, 64) array, resident across the grid.
            pl.BlockSpec((d, d), lambda i: (0, 0)),
        ],
        # Natural-shape output: no padded writeback, no wrapper slice pass.
        out_specs=pl.BlockSpec((block_b, d), lambda i: (i, 0)),
        compiler_params=pltpu.CompilerParams(
            dimension_semantics=("parallel",),
        ),
    )(x, w_fused)


def init_archetype_weights(
    key: jax.Array, d: int = INPUT_DIM, compute_dtype=jnp.float32
):
    """Build the 5 archetype matrices (mirrors __init__) and the fused weight.

    Returns:
      archetypes: (5, D, D) float32 raw A_k matrices (for reference checks).
      w_fused:    (D, D) compute_dtype matrix = (sum_k A_k)^T * QUANTUM_ABS/5,
                  laid out so the kernel computes A @ x as a row-vector
                  matmul x @ A^T.  No padding: D=64 stays the full last dim.
    """
    k1, k2, k3, k4, k5 = jax.random.split(key, 5)

    m1 = jax.random.normal(k1, (d, d), jnp.float32)
    a_christ = m1 @ m1.T                                   # compassion: M M^T

    m2 = jax.random.normal(k2, (d, d), jnp.float32)
    a_krishna = m2 / jnp.linalg.norm(m2)                   # dharma: Frobenius-normalized

    m3 = jax.random.normal(k3, (d, d), jnp.float32)
    a_allah = (m3 + m3.T) / 2.0                            # tawhid: symmetrized

    m4 = jax.random.normal(k4, (d, d), jnp.float32)
    a_buddha = m4 - jnp.trace(m4) * jnp.eye(d, dtype=jnp.float32) / d  # traceless shift

    m5 = jax.random.normal(k5, (d, d), jnp.float32)
    # np.exp(1j * M) is ELEMENTWISE in the reference; the final
    # torch.tensor(..., dtype=float32) cast discards the imaginary component,
    # so only Re(exp(1j*M)) = cos(M) contributes to the returned tensor.
    a_divine_fem = jnp.cos(m5)

    archetypes = jnp.stack(
        [a_christ, a_krishna, a_allah, a_buddha, a_divine_fem], axis=0
    )

    w_fused = jnp.sum(archetypes, axis=0).T * (QUANTUM_ABS / NUM_ARCHETYPES)
    return archetypes, w_fused.astype(compute_dtype)


if __name__ == "__main__":
    key = jax.random.PRNGKey(0)
    k_w, k_x = jax.random.split(key)

    archetypes, w_f32 = init_archetype_weights(k_w, INPUT_DIM, jnp.float32)
    _, w_bf16 = init_archetype_weights(k_w, INPUT_DIM, jnp.bfloat16)

    def reference(xs):
        # Built from the RAW archetype matrices (not the fused weight) so the
        # A^T stacking / fusion convention is actually validated.
        t = jnp.einsum(
            "kij,...j->...ki", archetypes, xs,
            precision=jax.lax.Precision.HIGHEST,
        )
        return jnp.mean(t, axis=-2) * QUANTUM_ABS

    # ---- single-vector case: exactly the module's forward signature --------
    x1 = jax.random.normal(k_x, (INPUT_DIM,), jnp.float32)
    out1 = jax.block_until_ready(quantum_archetype_forward(w_f32, x1))
    assert out1.shape == (INPUT_DIM,) and out1.dtype == jnp.float32
    assert jnp.allclose(out1, reference(x1), rtol=1e-2, atol=1e-2)

    # ---- batched case (B=20: not a tile multiple -> exercises cdiv grid,
    #      partial-block masking and the 2-step parallel grid) ---------------
    B = 20
    xb = jax.random.normal(k_x, (B, INPUT_DIM), jnp.float32)
    outb = jax.block_until_ready(quantum_archetype_forward(w_f32, xb))
    refb = reference(xb)
    assert outb.shape == (B, INPUT_DIM) and outb.dtype == jnp.float32
    assert jnp.allclose(outb, refb, rtol=1e-2, atol=1e-2)

    # ---- bf16 weights + bf16 activations (byte-halving path on every chip),
    #      f32 MXU accumulation, f32 output ----------------------------------
    outb_bf16 = jax.block_until_ready(
        quantum_archetype_forward(w_bf16, xb.astype(jnp.bfloat16))
    )
    assert outb_bf16.shape == (B, INPUT_DIM) and outb_bf16.dtype == jnp.float32
    assert jnp.allclose(outb_bf16, refb, rtol=1e-1, atol=1e-1)

    # TODO(synk): ArchetypalState bookkeeping (per-archetype numpy states,
    # coherence_level via np.corrcoef, datetime.now()) is host-side Python
    # state, not part of the returned tensor, so it is not reproduced here.
    print("KERNEL_OK")
</pallas_src>

<mosaic_0001>
module attributes {stable_mosaic.version = 11 : i64} {
  func.func @_fused_archetype_kernel(%arg0: i32, %arg1: memref<16x64xf32, #tpu.memory_space<vmem>>, %arg2: memref<64x64xf32, #tpu.memory_space<vmem>>, %arg3: memref<16x64xf32, #tpu.memory_space<vmem>>) attributes {dimension_semantics = [#tpu.dimension_semantics<parallel>], iteration_bounds = array<i64: 2>, scalar_prefetch = 0 : i64, scratch_operands = 0 : i64, tpu.core_type = #tpu.core_type<tc>, window_params = [{transform_indices = @transform_0, window_bounds = array<i64: 16, 64>}, {pipeline_mode = #tpu.pipeline_mode<synchronous>, transform_indices = @transform_1, window_bounds = array<i64: 64, 64>}, {transform_indices = @transform_2, window_bounds = array<i64: 16, 64>}]} {
    %c0 = arith.constant 0 : index
    %c0_0 = arith.constant 0 : index
    %0 = vector.load %arg2[%c0, %c0_0] : memref<64x64xf32, #tpu.memory_space<vmem>>, vector<64x64xf32>
    %c0_1 = arith.constant 0 : index
    %c0_2 = arith.constant 0 : index
    %1 = vector.load %arg1[%c0_1, %c0_2] : memref<16x64xf32, #tpu.memory_space<vmem>>, vector<16x64xf32>
    %cst = arith.constant dense<0.000000e+00> : vector<16x64xf32>
    %2 = tpu.matmul %1, %0, %cst {dimension_numbers = #tpu.dot_dimension_numbers<[1], [0], [0], [1], [0, 0, 1, 1], [], []>} : vector<16x64xf32>, vector<64x64xf32>, vector<16x64xf32> -> vector<16x64xf32>
    %c0_3 = arith.constant 0 : index
    %c0_4 = arith.constant 0 : index
    %3 = vector.load %arg3[%c0_3, %c0_4] : memref<16x64xf32, #tpu.memory_space<vmem>>, vector<16x64xf32>
    tpu.vector_store %arg3[%c0_3, %c0_4], %2 {strides = array<i32>} : memref<16x64xf32, #tpu.memory_space<vmem>>, vector<16x64xf32>,
    return
  }
  func.func @transform_0(%arg0: i32) -> (i32, i32) {
    %c0_i32 = arith.constant 0 : i32
    %c0_i32_0 = arith.constant 0 : i32
    return %arg0, %c0_i32 : i32, i32
  }
  func.func @transform_1(%arg0: i32) -> (i32, i32) {
    %c0_i32 = arith.constant 0 : i32
    %c0_i32_0 = arith.constant 0 : i32
    %c0_i32_1 = arith.constant 0 : i32
    return %c0_i32, %c0_i32_0 : i32, i32
  }
  func.func @transform_2(%arg0: i32) -> (i32, i32) {
    %c0_i32 = arith.constant 0 : i32
    %c0_i32_0 = arith.constant 0 : i32
    return %arg0, %c0_i32 : i32, i32
  }
}

</mosaic_0001>

<bundles_post_ra>
// kernel: tpu_custom_call.1
= control target key start
LH: loop header
LB: loop body
LE: loop exit
PB: predicated region body
PF: predicated region fallthrough
CT: control target
= control target key end

     0   :  { %7 = vsyncpa [#allocation3], 0  ;;  %s816_s0 = inlined_call_operand.hbm [shape: f32[20,64], index: 0, kind: input, shape index: {}]   ;;  %s817_s1 = inlined_call_operand.hbm [shape: f32[64,64], index: 1, kind: input, shape index: {}]   ;;  %s818_s2 = inlined_call_operand.hbm [shape: f32[20,64], index: 2, kind: output, shape index: {}]  }
   0x1   :  { %9 = vsyncpa [#allocation3 + $0x1], 0 }
   0x2   :  { %10 = vsyncpa [#allocation6], 0 }
   0x3   :  { %11 = vsyncpa [#allocation4], 0 }
   0x4   :  { %13 = vsyncpa [#allocation4 + $0x1], 0  ;;  %s614_s9 = smov 0   ;;  %s616_s10 = smov 0  }
   0x5   :  { %s618_s11 = smov 0   ;;  %s620_s12 = smov 0  }
   0x6 LB: > { %s635_s13 = sadd.s32 4294967295, %s588_s12   ;;  %s346_s14 = sadd.s32 4294967294, %s588_s12   ;;  %s588_s12 = sphi %s620_s12, %s835_s12   ;;  %s584_s11 = sphi %s618_s11, %s834_s11   ;;  %s580_s10 = sphi %s616_s10, %s833_s10   ;;  %s576_s9 = sphi %s614_s9, %s832_s9  }
   0x7   : > { %s639_s15 = sadd.s32 1, %s588_s12   ;;  %s26_s16 = sadd.s32 1, %s584_s11 }
   0x8   : > { %s23_s17 = ssub.s32 %s588_s12, %s639_s15  ;;  %p33_p0 = scmp.ne.s32.totalorder %s584_s11, %s580_s10 }
   0x9   : > { %p24_p1 = scmp.eq.s32.totalorder %s23_s17, 0  ;;  %p34_p2 = scmp.eq.s32.totalorder %s588_s12, 0 }
   0xa   : > { %p39_p3 = scmp.ne.s32.totalorder %s580_s10, %s576_s9  ;;  %p820_p4 = scmp.eq.s32.totalorder %s635_s13, 0 }
   0xb   : > { %s651_s18 = scalar_select %p24_p1, %s584_s11, %s26_s16  }
   0xc   : > { %p653_p5 = por %p34_p2, %p33_p0  ;;  %p659_p6 = por %p820_p4, %p39_p3 }
   0xd   : > { %p84_p7 = scmp.eq.s32.totalorder %s635_s13, 1  ;;  %p90_p8 = scmp.eq.s32.totalorder %s346_s14, 1 }
   0xe   : > { %p347_p9 = scmp.ge.s32.totalorder %s588_s12, 1  ;;  %p97_p10 = scmp.lt.s32.totalorder %s588_s12, 3 }
   0xf   : > { %p666_p11 = por %p84_p7, %p33_p0  ;;  %p670_p12 = por %p90_p8, %p39_p3 }
  0x10   : > { %p674_p13 = pnand %p347_p9, %p97_p10  ;;  %s108_s26 = sshll.u32 %s817_s1, 4  ;;  %s109_s26 = int_to_ptr.hbm [resolvable:$true] %s108_s26 }
  0x11   : > { %s824_s22 = scalar_select %p670_p12, 1, 0 }
  0x12   : > { %p388_p1 = pneg %p674_p13  ;;  %s590_s27 = smov [#allocation5]  }
  0x13   : > { %s110_s28 = sshll.u32 %s590_s27, 4  ;;  %s591_s29 = smov 128   ;;  %s111_s28 = int_to_ptr.vmem [resolvable:$true] %s110_s28 }
  0x14   : > { %p389_p0 = pnand %p388_p1, %p820_p4  ;;  %s592_s30 = smov 8  }
  0x15   : > { %p819_p2 = scmp.ge.s32.totalorder %s588_s12, 2 }
  0x16   : > { %391 = dma.hbm_to_vmem [thread:$0]  (!%p389_p0), %s109_s26, 1024, %s111_s28, [#allocation6], %s591_s29, %s591_s29, %s592_s30  }
  0x17   : > { %120 = sbr.rel (%p819_p2) target bundleno = 64 (0x40), region = 20 }
  0x1c   : > { %123 = sbr.rel (!%p653_p5) target bundleno = 64 (0x40), region = 24  ;;  %s124_s3 = sand.u32 (%p653_p5), 1, %s584_s11  }
  0x1d   : > { %s351_s4 = sshll.u32 (%p653_p5), %s588_s12, 1  ;;  %s350_s5 = sshll.u32 (%p653_p5), %s124_s3, 4 }
  0x1e   : > { %s130_s6 = ssub.s32 (%p653_p5), 3, %s351_s4  ;;  %s695_s16 = scalar_lea.sflag (%p653_p5), [#allocation3], %s124_s3 }
  0x1f   : > { %p131_p3 = scmp.lt.s32.totalorder (%p653_p5), %s130_s6, 2  ;;  %s128_s17 = scalar_lea.vmem (%p653_p5), [#allocation2], %s350_s5 }
  0x21   : > { %s837_s6 = smov (!%p131_p3, %s130_s6), 2 }
  0x22   : > { %s352_s7 = sshll.u32 %s837_s6, 3 }
  0x23   : > { %s134_s8 = ssub.s32 16, %s352_s7 }
  0x24   : > { %s135_s14 = sshll.u32 %s134_s8, 4 }
  0x25   : > { %136 = vsyncadd %s695_s16, %s135_s14  ;;  %p698_p5 = scmp.ne.s32.totalorder %s352_s7, 0  ;;  %s372_s24 = sshll.u32 %s588_s12, 4 }
  0x26   : > { %s139_s27 = scalar_lea.hbm %s816_s0, %s372_s24  ;;  %s706_s28 = sshll.u32 %s128_s17, 4  ;;  %s144_s28 = int_to_ptr.vmem [resolvable:$true] %s706_s28 }
  0x27   : > { %s141_s29 = sshll.u32 %s139_s27, 4  ;;  %s356_s30 = sshll.u32 %s837_s6, 7  ;;  %s709_s29 = int_to_ptr.hbm [resolvable:$true] %s141_s29 }
  0x28   : > { %s468_s3 = sshra.s32 %s709_s29, 4  ;;  %s470_s4 = sshrl.u32 %s356_s30, 4  ;;  %s469_s3 = int_to_ptr.hbm [resolvable:$true] %s468_s3 }
  0x29   : > { %s475_s5 = scalar_lea.hbm %s469_s3, %s470_s4  ;;  %s479_s14 = scalar_lea.hbm %s816_s0, 24 }
  0x2a   : > { %p476_p7 = scmp.ne.s32.totalorder %s469_s3, %s475_s5  ;;  %p480_p10 = scmp.lt.s32.totalorder %s469_s3, %s816_s0 }
  0x2b   : > { %p481_p1 = scmp.lt.s32.totalorder %s479_s14, %s475_s5 }
  0x2c   : > { %p477_p8 = pnand %p476_p7, %p698_p5 }
  0x2d   : > { %p482_p0 = por %p481_p1, %p480_p10 }
  0x2e   : > { %p478_p9 = pneg %p477_p8 }
  0x30   : > { %p483_p3 = pnand %p482_p0, %p478_p9 }
  0x32   : > { %486 = shalt.err (!%p483_p3)
}
  0x33   : > { %s487_s25 = sshra.s32 %s144_s28, 4  ;;  %s593_s27 = smov [#allocation2]   ;;  %s488_s25 = int_to_ptr.vmem [resolvable:$true] %s487_s25 }
  0x34   : > { %s494_s26 = scalar_lea.vmem %s488_s25, %s470_s4  ;;  %s498_s7 = scalar_lea.vmem %s593_s27, 32 }
  0x35   : > { %p495_p7 = scmp.ne.s32.totalorder %s488_s25, %s494_s26  ;;  %p500_p4 = scmp.lt.s32.totalorder %s498_s7, %s494_s26 }
  0x37   : > { %p496_p8 = pnand %p495_p7, %p698_p5 }
  0x39   : > { %p497_p2 = pneg %p496_p8 }
  0x3b   : > { %p502_p12 = pnand %p500_p4, %p497_p2 }
  0x3d   : > { %505 = shalt.err (!%p502_p12)
}
  0x3e   : > { %s594_s3 = smov 128   ;;  %s595_s5 = smov 8  }
  0x3f   : > { %149 = dma.hbm_to_vmem [thread:$0]  (%p698_p5), %s709_s29, %s356_s30, %s144_s28, %s695_s16, %s594_s3, %s594_s3, %s595_s5  }
  0x40 PF: > { %155 = sbr.rel (%p674_p13) target bundleno = 248 (0xf8), region = 28  ;;  %s738_s4 = sand.u32 (!%p674_p13), 1, %s580_s10  }
  0x41   : > { %s358_s8 = sshll.u32 (!%p674_p13), %s738_s4, 4  ;;  %s158_s14 = scalar_lea.sflag (!%p674_p13), [#allocation3], %s738_s4 }
  0x42   : > { %s161_s17 = scalar_lea.vmem (!%p674_p13), [#allocation2], %s358_s8 }
  0x45   : > { %563 = dma.done.wait (%p659_p6), %s158_s14, 256  }
  0x46   : > { %565 = vsyncadd (%p659_p6), %s158_s14, 4294967040  ;;  %p827_p4 = scmp.eq.s32.totalorder %s635_s13, 0 }
  0x48   : > { %567 = dma.done.wait (%p827_p4), [#allocation6], 1024   ;;  %p828_p12 = pmov %p827_p4 }
  0x49   : > { %v205_v0 = vld [vmem:[#allocation5 + $0x38] sm:$0xff]  ;;  %v204_v1 = vld [vmem:[#allocation5 + $0x30] sm:$0xff]  ;;  %v203_v2 = vld [vmem:[#allocation5 + $0x28] sm:$0xff]  ;;  %vm208_vm0 = vcmask 523264   ;;  %s187_s20 = scalar_lea.vmem [#allocation7], %s358_s8  ;;  %s241_s23 = scalar_lea.sflag [#allocation4], %s738_s4 }
  0x4a   : > { %569 = vsyncadd (%p828_p12), [#allocation6], 4294966272  ;;  %223 = vmatpush.msra.mxu0 %v205_v0  ;;  %374 = vmatpush.msra.mxu1 %v205_v0  ;;  %v202_v3 = vld [vmem:[#allocation5 + $0x20] sm:$0xff]  ;;  %v201_v4 = vld [vmem:[#allocation5 + $0x18] sm:$0xff]  ;;  %s364_s6 = sshll.u32 (%p666_p11), %s635_s13, 1 }
  0x4b   : > { %v200_v5 = vld [vmem:[#allocation5 + $0x10] sm:$0xff]  ;;  %v199_v6 = vld [vmem:[#allocation5 + $0x8] sm:$0xff]  ;;  %v198_v7 = vld [vmem:[#allocation5] sm:$0xff]  ;;  %s249_s16 = ssub.s32 (%p666_p11), 3, %s364_s6 }
  0x4c   : > { %224 = vmatpush.msra.mxu0 %v204_v1  ;;  %375 = vmatpush.msra.mxu1 %v204_v1  ;;  %v206_v8 = vld [vmem:[%s161_s17] sm:$0xff]  ;;  %v207_v9 = vld [vmem:[%s161_s17 + $0x8] sm:$0xff]  ;;  %p250_p6 = scmp.lt.s32.totalorder (%p666_p11), %s249_s16, 2 }
  0x4e   : > { %225 = vmatpush.msra.mxu0 %v203_v2  ;;  %376 = vmatpush.msra.mxu1 %v203_v2 }
  0x50   : > { %226 = vmatpush.msra.mxu0 %v202_v3  ;;  %377 = vmatpush.msra.mxu1 %v202_v3 }
  0x52   : > { %227 = vmatpush.msra.mxu0 %v201_v4  ;;  %378 = vmatpush.msra.mxu1 %v201_v4 }
  0x54   : > { %228 = vmatpush.msra.mxu0 %v200_v5  ;;  %379 = vmatpush.msra.mxu1 %v200_v5 }
  0x56   : > { %229 = vmatpush.msra.mxu0 %v199_v6  ;;  %380 = vmatpush.msra.mxu1 %v199_v6 }
  0x58   : > { %230 = vmatpush.msra.mxu0 %v198_v7  ;;  %381 = vmatpush.msra.mxu1 %v198_v7 }
  0x59   : > { %361 = vmatmul.msk.f32.vlgmr.msra.gmra.mxu0 %vm208_vm0, %v206_v8  ;;  %362 = vmatmul.msk.f32.vlgmr.msra.gmra.mxu1 %vm208_vm0, %v207_v9 }
  0xd4   : > { %247 = sbr.rel (!%p666_p11) target bundleno = 248 (0xf8), region = 40 }
  0xd6   : > { %v232_v10 = vpop.f32.mrf.mxu0  ;;  %v235_v11 = vpop.f32.mrf.mxu1 }
  0xd7   : > { %238 = vst.msk [vmem:[%s187_s20] sm:$0xff] %vm208_vm0, %v232_v10 }
  0xd8   : > { %239 = vst.msk [vmem:[%s187_s20 + $0x8] sm:$0xff] %vm208_vm0, %v235_v11 }
  0xd9   : > { %s839_s16 = smov (!%p250_p6, %s249_s16), 2 }
  0xda   : > { %s365_s19 = sshll.u32 %s839_s16, 3 }
  0xdb   : > { %s253_s28 = ssub.s32 16, %s365_s19 }
  0xdc   : > { %s254_s29 = sshll.u32 %s253_s28, 4 }
  0xdd   : > { %255 = vsyncadd %s241_s23, %s254_s29  ;;  %p763_p13 = scmp.ne.s32.totalorder %s365_s19, 0  ;;  %s373_s21 = sshll.u32 %s635_s13, 4 }
  0xde   : > { %s258_s26 = scalar_lea.hbm %s818_s2, %s373_s21  ;;  %s260_s27 = sshll.u32 %s187_s20, 4  ;;  %s771_s27 = int_to_ptr.vmem [resolvable:$true] %s260_s27 }
  0xdf   : > { %s262_s7 = sshll.u32 %s258_s26, 4  ;;  %s369_s3 = sshll.u32 %s839_s16, 7  ;;  %s773_s7 = int_to_ptr.hbm [resolvable:$true] %s262_s7 }
  0xe0   : > { %s507_s5 = sshra.s32 %s771_s27, 4  ;;  %s509_s8 = sshrl.u32 %s369_s3, 4  ;;  %s508_s5 = int_to_ptr.vmem [resolvable:$true] %s507_s5 }
  0xe1   : > { %s514_s14 = scalar_lea.vmem %s508_s5, %s509_s8  ;;  %s596_s13 = smov [#allocation7]  }
  0xe2   : > { %p515_p11 = scmp.ne.s32.totalorder %s508_s5, %s514_s14  ;;  %s518_s17 = scalar_lea.vmem %s596_s13, 32 }
  0xe3   : > { %p520_p9 = scmp.lt.s32.totalorder %s518_s17, %s514_s14 }
  0xe4   : > { %p516_p2 = pnand %p515_p11, %p763_p13 }
  0xe6   : > { %p517_p5 = pneg %p516_p2 }
  0xe8   : > { %p522_p10 = pnand %p520_p9, %p517_p5 }
  0xea   : > { %525 = shalt.err (!%p522_p10)
}
  0xeb   : > { %s526_s20 = sshra.s32 %s773_s7, 4  ;;  %s537_s29 = scalar_lea.hbm %s818_s2, 24  ;;  %s527_s20 = int_to_ptr.hbm [resolvable:$true] %s526_s20 }
  0xec   : > { %s533_s6 = scalar_lea.hbm %s527_s20, %s509_s8  ;;  %p538_p7 = scmp.lt.s32.totalorder %s527_s20, %s818_s2 }
  0xed   : > { %p534_p1 = scmp.ne.s32.totalorder %s527_s20, %s533_s6  ;;  %p539_p8 = scmp.lt.s32.totalorder %s537_s29, %s533_s6 }
  0xef   : > { %p535_p0 = pnand %p534_p1, %p763_p13  ;;  %p540_p4 = por %p539_p8, %p538_p7 }
  0xf1   : > { %p536_p3 = pneg %p535_p0 }
  0xf3   : > { %p541_p12 = pnand %p540_p4, %p536_p3 }
  0xf5   : > { %544 = shalt.err (!%p541_p12)
}
  0xf6   : > { %s597_s25 = smov 128   ;;  %s598_s26 = smov 8  }
  0xf7   : > { %268 = dma.vmem_to_hbm [thread:$0]  (%p763_p13), %s771_s27, %s369_s3, %s773_s7, %s241_s23, %s597_s25, %s597_s25, %s598_s26  }
  0xf8 PF: > { %s277_s5 = sand.u32 1, %s576_s9   ;;  %p830_p6 = scmp.ne.s32.totalorder %s824_s22, 0 }
  0xf9   : > { %p831_p11 = scmp.ge.s32.totalorder %s588_s12, 2  ;;  %s278_s8 = scalar_lea.sflag [#allocation4], %s277_s5 }
  0xfb   : > { %p393_p2 = pnand %p831_p11, %p830_p6 }
  0xfd   : > { %p394_p5 = pneg %p393_p2 }
  0xff   : > { %571 = dma.done.wait (%p394_p5), %s278_s8, 256  }
 0x100   : > { %573 = vsyncadd (%p394_p5), %s278_s8, 4294967040  ;;  %p16_p9 = scmp.ge.s32.totalorder %s639_s15, 4   ;;  %s832_s9 = smov %s580_s10 }
 0x101   : > { %s833_s10 = smov %s584_s11  ;;  %s834_s11 = smov %s651_s18 }
 0x102   : > { %s835_s12 = smov %s639_s15  ;;  %18 = sbr.rel (!%p16_p9) target bundleno = 6 (0x6), region = 77 }
 0x107   :  { %284 = vsyncpa [#allocation3], 1 }
 0x108   :  { %286 = vsyncpa [#allocation3 + $0x1], 1 }
 0x109   :  { %287 = vsyncpa [#allocation6], 1 }
 0x10a   :  { %288 = vsyncpa [#allocation4], 1 }
 0x10b   :  { %290 = vsyncpa [#allocation4 + $0x1], 1 }

</bundles_post_ra>
